<compile_context>
chip_gen: v6e
topology: v6e:2x2x1
jax: 0.10.0
libtpu: 0.0.40
codegen_flags: <defaults>
</compile_context>

<pallas_src>
import functools
import math

import jax
import jax.numpy as jnp
from jax.experimental import pallas as pl
from jax.experimental.pallas import tpu as pltpu


def _round_up(n: int, m: int) -> int:
    return (n + m - 1) // m * m


_ROW_TILE_CANDIDATES = (1024, 512, 256, 128, 64, 32, 16)
_HEADROOM_BYTES = 6 * 1024 * 1024  # bias, semaphores, compiler internal scratch


def _vmem_budget_bytes() -> int:
    """Per-generation VMEM budget (~75% of physical capacity)."""
    cap = None
    try:
        cap = getattr(pltpu.get_tpu_info(), "vmem_capacity_bytes", None)
    except Exception:
        cap = None
    if not cap:
        cap = 64 * 1024 * 1024  # conservative (v7x-sized) fallback
    return int(cap) * 3 // 4


def _pick_row_tile(rows: int, resident_bytes: int, per_row_stream_bytes: int,
                   budget: int) -> int:
    """Largest row tile whose double-buffered streamed tiles fit next to the
    resident operands; prefers >=2 grid points so both v7x TCs are used."""
    avail = max(budget - resident_bytes - _HEADROOM_BYTES, 0)
    cap = _round_up(min(rows, _ROW_TILE_CANDIDATES[0]), 16)
    tr = 16
    for cand in _ROW_TILE_CANDIDATES:
        if cand <= cap and cand * per_row_stream_bytes <= avail:
            tr = cand
            break
    # v7x has 2 TensorCores per chip: keep >=2 points on the parallel axis
    # whenever the problem is big enough to split.
    while tr > 16 and pl.cdiv(rows, tr) < 2:
        tr //= 2
    return tr


# ---------------------------------------------------------------------------
# Resident-weight path: grid over rows only, (D, D) weight held in VMEM.
# ---------------------------------------------------------------------------
def _resident_kernel(x_ref, w_ref, b_ref, o_ref):
    # x_ref: (TR, D) row tile (native dtype, bf16 -> MXU fast path)
    # w_ref: (D, D) resident weight; b_ref: (1, D) bias
    x = x_ref[...]
    acc = jnp.dot(x, w_ref[...], preferred_element_type=jnp.float32)  # MXU, f32 acc
    acc = acc + b_ref[...].astype(jnp.float32)                        # bias
    acc = acc + x.astype(jnp.float32)                                 # residual
    o_ref[...] = acc.astype(o_ref.dtype)


def _residual_linear_resident(x2, w, b2, budget):
    rows, d = x2.shape
    esize = x2.dtype.itemsize
    weight_bytes = d * d * esize                 # single-buffered
    per_row_stream = 2 * (2 * d * esize)         # x tile + out tile, 2 buffers each
    tr = _pick_row_tile(rows, weight_bytes, per_row_stream, budget)
    grid = (pl.cdiv(rows, tr),)

    cost = pl.CostEstimate(
        flops=2 * rows * d * d,
        transcendentals=0,
        bytes_accessed=(2 * rows * d + d * d + d) * esize,
    )

    return pl.pallas_call(
        _resident_kernel,
        out_shape=jax.ShapeDtypeStruct((rows, d), x2.dtype),
        grid_spec=pltpu.PrefetchScalarGridSpec(
            num_scalar_prefetch=0,
            grid=grid,
            in_specs=[
                # Streamed activation row tile.
                pl.BlockSpec((tr, d), lambda i: (i, 0)),
                # Resident operands: constant index_map -> single-buffer them.
                pl.BlockSpec((d, d), lambda i: (0, 0),
                             pipeline_mode=pl.Buffered(1)),
                pl.BlockSpec((1, d), lambda i: (0, 0),
                             pipeline_mode=pl.Buffered(1)),
            ],
            out_specs=pl.BlockSpec((tr, d), lambda i: (i, 0)),
        ),
        compiler_params=pltpu.CompilerParams(
            dimension_semantics=("parallel",),
            vmem_limit_bytes=int(budget),
        ),
        cost_estimate=cost,
    )(x2, w, b2)


# ---------------------------------------------------------------------------
# Output-column (N)-tiled path for large D / small VMEM (v7x): weight block
# (D, TN), N outer so the weight slab is reused across inner row tiles.
# ---------------------------------------------------------------------------
def _ntiled_kernel(x_ref, w_ref, b_ref, o_ref, *, tn):
    # x_ref: (TR, D) full-width row tile; w_ref: (D, TN); b_ref: (1, TN)
    j = pl.program_id(0)  # output-column tile index (outer grid axis)
    x = x_ref[...]
    acc = jnp.dot(x, w_ref[...], preferred_element_type=jnp.float32)
    acc = acc + b_ref[...].astype(jnp.float32)
    col0 = pl.multiple_of(j * tn, tn)
    acc = acc + x_ref[:, pl.ds(col0, tn)].astype(jnp.float32)  # residual columns
    o_ref[...] = acc.astype(o_ref.dtype)


def _residual_linear_ntiled(x2, w, b2, budget, tn):
    rows, d = x2.shape
    esize = x2.dtype.itemsize
    resident_bytes = 2 * d * tn * esize + 2 * tn * esize      # weight slab + bias (2 bufs)
    per_row_stream = 2 * (d + tn) * esize                      # x + out tiles (2 bufs)
    tr = _pick_row_tile(rows, resident_bytes, per_row_stream, budget)
    grid = (d // tn, pl.cdiv(rows, tr))  # N outer, rows inner (weight reused)

    cost = pl.CostEstimate(
        flops=2 * rows * d * d,
        transcendentals=0,
        bytes_accessed=((d // tn) * rows * d + d * d + d) * esize,
    )

    return pl.pallas_call(
        functools.partial(_ntiled_kernel, tn=tn),
        out_shape=jax.ShapeDtypeStruct((rows, d), x2.dtype),
        grid_spec=pltpu.PrefetchScalarGridSpec(
            num_scalar_prefetch=0,
            grid=grid,
            in_specs=[
                pl.BlockSpec((tr, d), lambda j, i: (i, 0)),   # full-width x row tile
                pl.BlockSpec((d, tn), lambda j, i: (0, j)),   # weight column slab
                pl.BlockSpec((1, tn), lambda j, i: (0, j)),   # bias slab
            ],
            out_specs=pl.BlockSpec((tr, tn), lambda j, i: (i, j)),
        ),
        compiler_params=pltpu.CompilerParams(
            dimension_semantics=("parallel", "parallel"),
            vmem_limit_bytes=int(budget),
        ),
        cost_estimate=cost,
    )(x2, w, b2)


# ---------------------------------------------------------------------------
# Public wrapper.
# ---------------------------------------------------------------------------
def residual_linear(x, w, b, *, force_n_tiling=False, n_tile=None):
    """Residual(Linear): out = x @ w + b + x.

    x: (..., D); w: (D, D) laid out [in, out]; b: (D,).
    NOTE: torch.nn.Linear stores weight as [out, in] — pass weight.T here.
    """
    orig_shape = x.shape
    d = orig_shape[-1]
    rows = math.prod(orig_shape[:-1])
    x2 = x.reshape(rows, d)
    b2 = b.reshape(1, d)

    budget = _vmem_budget_bytes()
    esize = x2.dtype.itemsize
    # Resident path needs the full (D, D) weight plus one minimal
    # double-buffered row tile of x/out to fit in the VMEM budget.
    resident_fits = (d * d * esize + 16 * 2 * (2 * d * esize)
                     + _HEADROOM_BYTES) <= budget

    use_ntiled = (force_n_tiling or not resident_fits) and d % 128 == 0
    if use_ntiled:
        tn = n_tile if n_tile is not None else (256 if d % 256 == 0 else 128)
        if d % tn != 0:
            use_ntiled = False
    if use_ntiled:
        out2 = _residual_linear_ntiled(x2, w, b2, budget, tn)
    else:
        out2 = _residual_linear_resident(x2, w, b2, budget)
    return out2.reshape(orig_shape)


def residual_linear_ref(x, w, b):
    xf = x.astype(jnp.float32)
    out = xf @ w.astype(jnp.float32) + b.astype(jnp.float32) + xf
    return out.astype(x.dtype)


if __name__ == "__main__":
    key = jax.random.PRNGKey(0)
    kx, kw, kb, kx2, kw2, kb2 = jax.random.split(key, 6)

    # --- Test 1: small shape, resident-weight path ---------------------------
    B, S, D = 2, 8, 128
    x = jax.random.normal(kx, (B, S, D), dtype=jnp.float32).astype(jnp.bfloat16)
    w = (jax.random.normal(kw, (D, D), dtype=jnp.float32) * 0.02).astype(jnp.bfloat16)
    b = (jax.random.normal(kb, (D,), dtype=jnp.float32) * 0.01).astype(jnp.bfloat16)

    out = jax.block_until_ready(residual_linear(x, w, b))
    ref = residual_linear_ref(x, w, b)
    assert out.shape == (B, S, D)
    assert jnp.allclose(out.astype(jnp.float32), ref.astype(jnp.float32),
                        atol=5e-2, rtol=5e-2)

    # --- Test 2: exercise the N-tiled (large-D / v7x) path at a small shape --
    D2 = 256
    x_b = jax.random.normal(kx2, (B, S, D2), dtype=jnp.float32).astype(jnp.bfloat16)
    w_b = (jax.random.normal(kw2, (D2, D2), dtype=jnp.float32) * 0.02).astype(jnp.bfloat16)
    b_b = (jax.random.normal(kb2, (D2,), dtype=jnp.float32) * 0.01).astype(jnp.bfloat16)

    out_b = jax.block_until_ready(
        residual_linear(x_b, w_b, b_b, force_n_tiling=True, n_tile=128))
    ref_b = residual_linear_ref(x_b, w_b, b_b)
    assert out_b.shape == (B, S, D2)
    assert jnp.allclose(out_b.astype(jnp.float32), ref_b.astype(jnp.float32),
                        atol=5e-2, rtol=5e-2)

    print("KERNEL_OK")
</pallas_src>

<mosaic_0001>
module attributes {stable_mosaic.version = 11 : i64} {
  func.func @_resident_kernel(%arg0: i32, %arg1: memref<16x128xbf16, #tpu.memory_space<vmem>>, %arg2: memref<128x128xbf16, #tpu.memory_space<vmem>>, %arg3: memref<1x128xbf16, #tpu.memory_space<vmem>>, %arg4: memref<16x128xbf16, #tpu.memory_space<vmem>>) attributes {dimension_semantics = [#tpu.dimension_semantics<parallel>], iteration_bounds = array<i64: 1>, scalar_prefetch = 0 : i64, scratch_operands = 0 : i64, tpu.core_type = #tpu.core_type<tc>, window_params = [{transform_indices = @transform_0, window_bounds = array<i64: 16, 128>}, {pipeline_mode = #tpu.pipeline_mode<synchronous>, transform_indices = @transform_1, window_bounds = array<i64: 128, 128>}, {pipeline_mode = #tpu.pipeline_mode<synchronous>, transform_indices = @transform_2, window_bounds = array<i64: 1, 128>}, {transform_indices = @transform_3, window_bounds = array<i64: 16, 128>}]} {
    %c0 = arith.constant 0 : index
    %c0_0 = arith.constant 0 : index
    %0 = vector.load %arg1[%c0, %c0_0] : memref<16x128xbf16, #tpu.memory_space<vmem>>, vector<16x128xbf16>
    %c0_1 = arith.constant 0 : index
    %c0_2 = arith.constant 0 : index
    %1 = vector.load %arg2[%c0_1, %c0_2] : memref<128x128xbf16, #tpu.memory_space<vmem>>, vector<128x128xbf16>
    %cst = arith.constant dense<0.000000e+00> : vector<16x128xf32>
    %2 = tpu.matmul %0, %1, %cst {dimension_numbers = #tpu.dot_dimension_numbers<[1], [0], [0], [1], [0, 0, 1, 1], [], []>} : vector<16x128xbf16>, vector<128x128xbf16>, vector<16x128xf32> -> vector<16x128xf32>
    %c0_3 = arith.constant 0 : index
    %c0_4 = arith.constant 0 : index
    %3 = vector.load %arg3[%c0_3, %c0_4] : memref<1x128xbf16, #tpu.memory_space<vmem>>, vector<1x128xbf16>
    %4 = arith.extf %3 : vector<1x128xbf16> to vector<1x128xf32>
    %5 = vector.broadcast %4 : vector<1x128xf32> to vector<16x128xf32>
    %6 = arith.addf %2, %5 : vector<16x128xf32>
    %7 = arith.extf %0 : vector<16x128xbf16> to vector<16x128xf32>
    %8 = arith.addf %6, %7 : vector<16x128xf32>
    %9 = arith.truncf %8 : vector<16x128xf32> to vector<16x128xbf16>
    %c0_5 = arith.constant 0 : index
    %c0_6 = arith.constant 0 : index
    %10 = vector.load %arg4[%c0_5, %c0_6] : memref<16x128xbf16, #tpu.memory_space<vmem>>, vector<16x128xbf16>
    tpu.vector_store %arg4[%c0_5, %c0_6], %9 {strides = array<i32>} : memref<16x128xbf16, #tpu.memory_space<vmem>>, vector<16x128xbf16>,
    return
  }
  func.func @transform_0(%arg0: i32) -> (i32, i32) {
    %c0_i32 = arith.constant 0 : i32
    %c0_i32_0 = arith.constant 0 : i32
    return %arg0, %c0_i32 : i32, i32
  }
  func.func @transform_1(%arg0: i32) -> (i32, i32) {
    %c0_i32 = arith.constant 0 : i32
    %c0_i32_0 = arith.constant 0 : i32
    %c0_i32_1 = arith.constant 0 : i32
    return %c0_i32, %c0_i32_0 : i32, i32
  }
  func.func @transform_2(%arg0: i32) -> (i32, i32) {
    %c0_i32 = arith.constant 0 : i32
    %c0_i32_0 = arith.constant 0 : i32
    %c0_i32_1 = arith.constant 0 : i32
    return %c0_i32, %c0_i32_0 : i32, i32
  }
  func.func @transform_3(%arg0: i32) -> (i32, i32) {
    %c0_i32 = arith.constant 0 : i32
    %c0_i32_0 = arith.constant 0 : i32
    return %arg0, %c0_i32 : i32, i32
  }
}

</mosaic_0001>

<bundles_post_ra>
// kernel: tpu_custom_call.1
= control target key start
LH: loop header
LB: loop body
LE: loop exit
PB: predicated region body
PF: predicated region fallthrough
CT: control target
= control target key end

     0   :  { %8 = vsyncpa [#allocation3], 0  ;;  %s373_s0 = inlined_call_operand.hbm [shape: bf16[16,128], index: 0, kind: input, shape index: {}]   ;;  %s374_s1 = inlined_call_operand.hbm [shape: bf16[128,128], index: 1, kind: input, shape index: {}]   ;;  %s375_s2 = inlined_call_operand.vmem [shape: bf16[1,128], index: 2, kind: input, shape index: {}]   ;;  %s376_s3 = inlined_call_operand.hbm [shape: bf16[16,128], index: 3, kind: output, shape index: {}]  }
   0x1   :  { %9 = vsyncpa [#allocation6], 0 }
   0x2   :  { %10 = vsyncpa [#allocation4], 0  ;;  %s325_s12 = smov [#allocation2]  }
   0x3   :  { %s16_s13 = sshll.u32 %s325_s12, 4  ;;  %s17_s13 = int_to_ptr.vmem [resolvable:$true] %s16_s13 }
   0x4   :  { %s267_s14 = scalar_lea.vmem %s17_s13, 128  ;;  %p272_p1 = scmp.lt.s32.totalorder %s17_s13, %s17_s13 }
   0x5   :  { %p268_p0 = scmp.ne.s32.totalorder %s17_s13, %s267_s14  ;;  %p273_p2 = scmp.lt.s32.totalorder %s267_s14, %s267_s14 }
   0x7   :  { %p274_p3 = por %p273_p2, %p272_p1 }
   0x9   :  { %p275_p4 = pnand %p274_p3, %p268_p0 }
   0xb   :  { %278 = shalt.err (!%p275_p4)
}
   0xc   :  { %s326_s15 = smov 64   ;;  %s327_s16 = smov 4  }
   0xd   :  { %22 = dma.hbm_to_vmem [thread:$0]  %s373_s0, 128, %s17_s13, [#allocation3], %s326_s15, %s326_s15, %s327_s16  }
   0xe   :  { %s328_s19 = smov [#allocation5]  }
   0xf   :  { %s28_s20 = sshll.u32 %s328_s19, 4  ;;  %s29_s20 = int_to_ptr.vmem [resolvable:$true] %s28_s20 }
  0x10   :  { %s287_s21 = scalar_lea.vmem %s29_s20, 1024  ;;  %p292_p6 = scmp.lt.s32.totalorder %s29_s20, %s29_s20 }
  0x11   :  { %p288_p5 = scmp.ne.s32.totalorder %s29_s20, %s287_s21  ;;  %p293_p7 = scmp.lt.s32.totalorder %s287_s21, %s287_s21 }
  0x13   :  { %p294_p8 = por %p293_p7, %p292_p6 }
  0x15   :  { %p295_p9 = pnand %p294_p8, %p288_p5 }
  0x17   :  { %298 = shalt.err (!%p295_p9)
}
  0x18   :  { %34 = dma.hbm_to_vmem [thread:$0]  %s374_s1, 1024, %s29_s20, [#allocation6], %s326_s15, %s326_s15, %s327_s16  }
  0x19   :  { %319 = dma.done.wait [#allocation3], 128  }
  0x1a   :  { %320 = vsyncadd [#allocation3], 4294967168 }
  0x1b   :  { %321 = dma.done.wait [#allocation6], 1024  }
  0x1c   :  { %322 = vsyncadd [#allocation6], 4294966272  ;;  %v329_v0 = vmov 0.0   ;;  %vm330_vm0 = vmmov 0   ;;  %v249_v1 = vld [vmem:[#allocation5 + $0x38] sm:$0xff]   ;;  %v250_v2 = vld [vmem:[#allocation5 + $0x30] sm:$0xff]   ;;  %v64_v10 = vlaneseq }
  0x1d   :  { %222 = vmatprep.subr.bf16.mxu0 %v329_v0  ;;  %238 = vmatprep.mubr.msk.bf16.mxu0 %vm330_vm0, %v329_v0  ;;  %v251_v3 = vld [vmem:[#allocation5 + $0x28] sm:$0xff]   ;;  %v252_v4 = vld [vmem:[#allocation5 + $0x20] sm:$0xff]   ;;  %v253_v5 = vld [vmem:[#allocation5 + $0x18] sm:$0xff]   ;;  %s331_s24 = smov [#allocation7]  }
  0x1e   :  { %223 = vmatpush3.bf16.msra.mxu0 %v249_v1  ;;  %v254_v6 = vld [vmem:[#allocation5 + $0x10] sm:$0xff]   ;;  %v255_v7 = vld [vmem:[#allocation5 + $0x8] sm:$0xff]   ;;  %v256_v8 = vld [vmem:[#allocation5] sm:$0xff]   ;;  %v65_v11 = vshrl.u32 %v64_v10, 7  ;;  %s182_s25 = sshll.u32 %s331_s24, 4  ;;  %s183_s25 = int_to_ptr.vmem [resolvable:$true] %s182_s25 }
  0x1f   :  { %224 = vmatprep.subr.bf16.mxu0 %v329_v0  ;;  %v44_v9 = vld [vmem:[#allocation2] sm:$0xff]   ;;  %s299_s26 = scalar_lea.vmem %s183_s25, 128  ;;  %p304_p11 = scmp.lt.s32.totalorder %s183_s25, %s183_s25 }
  0x20   :  { %v62_v12 = vld [vmem:[%s375_s2] sm:$0x1]  ;;  %v66_v14 = vsub.s32 0, %v65_v11  ;;  %v163_v19 = vunpack.c.l.bf16 %v44_v9  ;;  %v164_v20 = vunpack.c.h.bf16 %v44_v9  ;;  %p300_p10 = scmp.ne.s32.totalorder %s183_s25, %s299_s26  ;;  %p305_p12 = scmp.lt.s32.totalorder %s299_s26, %s299_s26 }
  0x21   :  { %v63_v13 = vunpack.c.l.bf16 %v62_v12 }
  0x22   :  { %225 = vmatpush3.bf16.msra.mxu0 %v250_v2  ;;  %p306_p13 = por %p305_p12, %p304_p11 }
  0x23   :  { %226 = vmatprep.subr.bf16.mxu0 %v329_v0  ;;  %v67_v15 = vrot.slane %v63_v13, %v66_v14 }
  0x24   :  { %p307_p0 = pnand %p306_p13, %p300_p10 }
  0x26   :  { %227 = vmatpush3.bf16.msra.mxu0 %v251_v3 }
  0x27   :  { %228 = vmatprep.subr.bf16.mxu0 %v329_v0 }
  0x2a   :  { %229 = vmatpush3.bf16.msra.mxu0 %v252_v4 }
  0x2b   :  { %230 = vmatprep.subr.bf16.mxu0 %v329_v0 }
  0x2e   :  { %231 = vmatpush3.bf16.msra.mxu0 %v253_v5 }
  0x2f   :  { %232 = vmatprep.subr.bf16.mxu0 %v329_v0 }
  0x32   :  { %233 = vmatpush3.bf16.msra.mxu0 %v254_v6 }
  0x33   :  { %234 = vmatprep.subr.bf16.mxu0 %v329_v0 }
  0x36   :  { %235 = vmatpush3.bf16.msra.mxu0 %v255_v7 }
  0x37   :  { %236 = vmatprep.subr.bf16.mxu0 %v329_v0 }
  0x3a   :  { %237 = vmatpush3.bf16.msra.mxu0 %v256_v8 }
  0x3d   :  { %239 = vmatmul.mubr.bf16.vlgmr.msra.gmra.mxu0 %v44_v9 }
  0xfd   :  { %v156_v16 = vpop.f32.mrf.mxu0 }
  0xfe   :  { %v157_v18 = vadd.f32 %v156_v16, %v67_v15 }
  0xff   :  { %v240_v17 = vpop.f32.mrf.mxu0 }
 0x100   :  { %v165_v24 = vadd.f32 %v163_v19, %v157_v18 }
 0x101   :  { %v159_v21 = vpop.f32.mrf.mxu0 }
 0x102   :  { %v160_v22 = vadd.f32 %v159_v21, %v67_v15 }
 0x103   :  { %v241_v23 = vpop.f32.mrf.mxu0 }
 0x104   :  { %v166_v25 = vadd.f32 %v164_v20, %v160_v22 }
 0x106   :  { %v211_v26 = vpack.c.bf16 %v166_v25, %v165_v24 }
 0x108   :  { %212 = vst [vmem:[#allocation7] sm:$0xff] %v211_v26  }
 0x109   :  { %310 = shalt.err (!%p307_p0)
}
 0x10a   :  { %188 = dma.vmem_to_hbm [thread:$0]  %s183_s25, 128, %s376_s3, [#allocation4], %s326_s15, %s326_s15, %s327_s16  }
 0x10b   :  { %323 = dma.done.wait [#allocation4], 128  }
 0x10c   :  { %324 = vsyncadd [#allocation4], 4294967168 }
 0x10d   :  { %192 = vsyncpa [#allocation3], 1 }
 0x10e   :  { %193 = vsyncpa [#allocation6], 1 }
 0x10f   :  { %194 = vsyncpa [#allocation4], 1 }

</bundles_post_ra>
